<compile_context>
chip_gen: v6e
topology: v6e:2x2x1
jax: 0.10.0
libtpu: 0.0.40
codegen_flags: <defaults>
</compile_context>

<pallas_src>
import functools

import jax
import jax.numpy as jnp
from jax.experimental import pallas as pl
from jax.experimental.pallas import tpu as pltpu


def _round_up(x, m):
    return ((x + m - 1) // m) * m


@functools.lru_cache(maxsize=None)
def _roll_matches_np_roll() -> bool:
    """pltpu.roll convention check (positive shift moves data toward higher index).

    Defaults to the documented np.roll-equivalent semantics so the wrapper stays
    usable on AOT / CPU tracing hosts; when a real TPU backend is present it is
    verified once with a tiny probe kernel (cached for the process lifetime).
    """
    try:
        if jax.devices()[0].platform != "tpu":
            return True

        def probe(x_ref, o_ref):
            o_ref[...] = pltpu.roll(x_ref[...], 1, 1)

        x = jax.lax.broadcasted_iota(jnp.float32, (8, 128), 1)
        out = pl.pallas_call(
            probe, out_shape=jax.ShapeDtypeStruct((8, 128), jnp.float32))(x)
        return bool(out[0, 0] == 127.0)
    except Exception:
        return True


def _cspn_kernel(k_ref, xpad_ref, x0_ref, o_ref, *,
                 ksize, dilation, row_tile, halo, w, roll_fwd):
    """One (batch, row-tile) grid step.

    k_ref    : (1, k*k, TR, w)      affinity weights (unpadded, full-dim lanes)
    xpad_ref : (1, H_depth, W)      zero-padded depth map (resident across tiles)
    x0_ref   : (1, TR, w)           original depth (replaces the center tap)
    o_ref    : (1, TR, w)           propagated output
    """
    kk = ksize * ksize
    mid = (kk - 1) // 2
    tr = row_tile
    nwin = tr + halo

    def shift_up(arr, s, axis):
        # result[..., i, ...] = arr[..., i + s, ...] for all indices we keep; the
        # wrap-around values land only in zero-padded columns or discarded rows.
        if s == 0:
            return arr
        n = arr.shape[axis]
        amount = (n - s) if roll_fwd else s
        return pltpu.roll(arr, amount, axis)

    r0 = pl.program_id(1) * tr
    if tr % 8 == 0:
        r0 = pl.multiple_of(r0, 8)

    # One aligned load of the padded-depth row window covering every row tap; all
    # k*k taps are derived from it with XLU rolls (no k*k misaligned VMEM slices).
    window = xpad_ref[0, pl.ds(r0, nwin), :].astype(jnp.float32)    # (nwin, W)
    x0 = x0_ref[0].astype(jnp.float32)                              # (tr, w)

    acc = None
    for dy in range(ksize):
        wrow = shift_up(window, dy * dilation, 0)[:tr, :]           # (tr, W)
        for dx in range(ksize):
            idx = dy * ksize + dx
            if idx == mid:
                patch = x0                                          # center-tap swap
            else:
                patch = shift_up(wrow, dx * dilation, 1)[:, :w]     # (tr, w)
            term = k_ref[0, idx].astype(jnp.float32) * patch
            acc = term if acc is None else acc + term               # immediate accumulate
    o_ref[0] = acc.astype(o_ref.dtype)                              # single store


def _plan_tiles(h, w, W, kk, halo, aff_bytes, io_bytes, max_row_tile):
    """Pick the row tile (multiple of 8) and the per-call VMEM limit.

    Per-grid-step working set (blocks are double-buffered by the pipeline):
      affinity block    2 * kk * tr * w * aff_bytes
      x0 + out blocks   2 * 2 * tr * w * io_bytes
      resident depth    2 * (round_up(h, tr) + halo) * W * io_bytes
      f32 temporaries   ~6 * tr * W * 4     (window, wrow, patch, acc + slop)
    """
    try:
        vmem_cap = int(pltpu.get_tpu_info().vmem_capacity_bytes)
    except Exception:
        vmem_cap = 64 * 1024 * 1024          # conservative (v7x-sized) fallback
    vmem_limit = min(int(vmem_cap * 0.6), 96 * 1024 * 1024)
    budget = vmem_limit - 4 * 1024 * 1024

    def working_set(tr):
        return (2 * kk * tr * w * aff_bytes
                + 4 * tr * w * io_bytes
                + 2 * (_round_up(h, tr) + halo) * W * io_bytes
                + 6 * tr * W * 4)

    tr = max(8, min((h // 8) * 8, _round_up(max_row_tile, 8)))
    while tr > 8 and working_set(tr) > budget:
        tr -= 8
    # Equalize tile sizes: same number of grid steps, fewer garbage rows and less
    # depth-map padding (padding-waste-aware choice).
    n_tiles = -(-h // tr)
    tr = max(8, _round_up(-(-h // n_tiles), 8))
    n_tiles = -(-h // tr)
    h_depth = n_tiles * tr + halo

    # Make sure the limit actually covers the plan (tiny shapes / very wide rows).
    vmem_limit = max(vmem_limit,
                     min(working_set(tr) + 4 * 1024 * 1024,
                         vmem_cap - 2 * 1024 * 1024))
    return tr, n_tiles, h_depth, int(vmem_limit)


def cspn_accelerate(kernel, inp, inp0, *, kernel_size=3, dilation=1, padding=1,
                    stride=1, max_row_tile=512):
    """kernel: (bs, k*k, h, w) affinity; inp, inp0: (bs, 1, h, w).  -> (bs, 1, h, w).

    The affinity map is streamed exactly as given (no pad / cast round trip in
    HBM).  Pass it already stored as bf16 to halve the dominant HBM stream; the
    kernel always accumulates in f32.
    """
    assert stride == 1, "CSPN propagation assumes stride == 1 (L must equal h*w)"
    bs = inp.shape[0]
    h, w = inp.shape[2], inp.shape[3]
    kk = kernel_size * kernel_size
    assert 2 * padding == dilation * (kernel_size - 1), "unfold output must be h*w"
    p = padding

    affinity = kernel.reshape(bs, kk, h, w)    # dominant stream: untouched
    x = inp.reshape(bs, h, w)
    x0 = inp0.reshape(bs, h, w)

    # Lane-aligned padded width / 8-aligned row halo for the SMALL depth map only.
    W = _round_up(w + 2 * p, 128)
    halo = _round_up(2 * p, 8)

    tr, n_tiles, h_depth, vmem_limit = _plan_tiles(
        h, w, W, kk, halo,
        jnp.dtype(affinity.dtype).itemsize, jnp.dtype(inp.dtype).itemsize,
        max_row_tile)

    # One pad folds the unfold-style zero boundary AND the lane/row alignment, and
    # it only touches the 1/k^2-sized depth operand.
    xpad = jnp.pad(x, ((0, 0), (p, h_depth - h - p), (p, W - w - p)))

    body = functools.partial(
        _cspn_kernel, ksize=kernel_size, dilation=dilation, row_tile=tr,
        halo=halo, w=w, roll_fwd=_roll_matches_np_roll())

    # TODO(synk): for very tall images (h_depth * W no longer VMEM-friendly) switch
    # the resident depth block to a per-tile (tr + halo)-row halo window.
    out = pl.pallas_call(
        body,
        out_shape=jax.ShapeDtypeStruct((bs, h, w), inp.dtype),
        grid_spec=pltpu.PrefetchScalarGridSpec(
            num_scalar_prefetch=0,
            grid=(bs, n_tiles),
            in_specs=[
                # Affinity: unpadded; last dim is the full array dim (exempt from
                # the 128-lane rule).  Partial edge row tiles are fine: the rows
                # beyond h only feed output rows that are masked on store.
                pl.BlockSpec((1, kk, tr, w), lambda b, t: (b, 0, t, 0)),
                # Padded depth: block index constant across the row-tile axis, so
                # it stays resident in VMEM per batch element and supplies the halo.
                pl.BlockSpec((1, h_depth, W), lambda b, t: (b, 0, 0)),
                pl.BlockSpec((1, tr, w), lambda b, t: (b, t, 0)),
            ],
            out_specs=pl.BlockSpec((1, tr, w), lambda b, t: (b, t, 0)),
        ),
        compiler_params=pltpu.CompilerParams(
            # Disjoint output tiles on both axes -> both TensorCores get work.
            dimension_semantics=("parallel", "parallel"),
            vmem_limit_bytes=vmem_limit,
        ),
    )(affinity, xpad, x0)

    return out.reshape(bs, 1, h, w)


def _cspn_reference(kernel, inp, inp0, *, kernel_size=3, dilation=1, padding=1):
    """Pure-JAX reference (im2col via shifts) for verification."""
    bs, _, h, w = inp.shape
    kk = kernel_size * kernel_size
    mid = (kk - 1) // 2
    kernel = kernel.astype(jnp.float32).reshape(bs, kk, h, w)
    x = inp.reshape(bs, h, w).astype(jnp.float32)
    x0 = inp0.reshape(bs, h, w).astype(jnp.float32)
    xpad = jnp.pad(x, ((0, 0), (padding, padding), (padding, padding)))
    out = jnp.zeros((bs, h, w), jnp.float32)
    for idx in range(kk):
        dy, dx = divmod(idx, kernel_size)
        if idx == mid:
            patch = x0
        else:
            patch = xpad[:, dy * dilation:dy * dilation + h, dx * dilation:dx * dilation + w]
        out = out + kernel[:, idx] * patch
    return out.reshape(bs, 1, h, w).astype(inp.dtype)


if __name__ == "__main__":
    key = jax.random.PRNGKey(0)

    def run_case(case_id, bs, h, w, ksize, dil, pad, *, affinity_dtype=jnp.float32,
                 max_row_tile=512, atol=1e-5, rtol=1e-5):
        kk = ksize * ksize
        k1, k2, k3 = jax.random.split(jax.random.fold_in(key, case_id), 3)
        affinity = jax.random.normal(k1, (bs, kk, h, w), dtype=jnp.float32)
        # bf16 affinity is the recommended production storage; the cast is done by
        # the producer (here: test-data construction), never inside the wrapper.
        affinity = affinity.astype(affinity_dtype)
        depth = jax.random.normal(k2, (bs, 1, h, w), dtype=jnp.float32)
        depth0 = jax.random.normal(k3, (bs, 1, h, w), dtype=jnp.float32)

        out = cspn_accelerate(affinity, depth, depth0,
                              kernel_size=ksize, dilation=dil, padding=pad,
                              max_row_tile=max_row_tile)
        out = jax.block_until_ready(out)

        ref = _cspn_reference(affinity, depth, depth0,
                              kernel_size=ksize, dilation=dil, padding=pad)
        assert out.shape == (bs, 1, h, w), f"case {case_id}: bad shape {out.shape}"
        assert jnp.allclose(out, ref, atol=atol, rtol=rtol), (
            f"case {case_id}: max err {jnp.max(jnp.abs(out.astype(jnp.float32) - ref.astype(jnp.float32)))}")

    # 1) Base 3x3 CSPN step (f32), single row tile per batch element.
    run_case(0, 2, 16, 16, 3, 1, 1)
    # 2) Multi-row-tile grid with a partial edge tile (h=20 is not a multiple of 8).
    run_case(1, 2, 20, 40, 3, 1, 1, max_row_tile=8)
    # 3) 5x5 kernel, several row tiles (exercises the halo and dx/dy rolls).
    run_case(2, 2, 32, 24, 5, 1, 2, max_row_tile=8)
    # 4) Dilation 2 (padding 2) 3x3 kernel.
    run_case(3, 2, 16, 16, 3, 2, 2)
    # 5) bf16-stored affinity (recommended production layout); f32 accumulation.
    run_case(4, 2, 16, 16, 3, 1, 1, affinity_dtype=jnp.bfloat16, atol=1e-3, rtol=1e-3)

    print("KERNEL_OK")
</pallas_src>

<mosaic_0001>
module attributes {stable_mosaic.version = 11 : i64} {
  func.func @_cspn_kernel(%arg0: i32, %arg1: i32, %arg2: memref<1x9x16x16xf32, #tpu.memory_space<vmem>>, %arg3: memref<1x24x128xf32, #tpu.memory_space<vmem>>, %arg4: memref<1x16x16xf32, #tpu.memory_space<vmem>>, %arg5: memref<1x16x16xf32, #tpu.memory_space<vmem>>) attributes {dimension_semantics = [#tpu.dimension_semantics<parallel>, #tpu.dimension_semantics<parallel>], iteration_bounds = array<i64: 2, 1>, scalar_prefetch = 0 : i64, scratch_operands = 0 : i64, tpu.core_type = #tpu.core_type<tc>, window_params = [{transform_indices = @transform_0, window_bounds = array<i64: 1, 9, 16, 16>}, {transform_indices = @transform_1, window_bounds = array<i64: 1, 24, 128>}, {transform_indices = @transform_2, window_bounds = array<i64: 1, 16, 16>}, {transform_indices = @transform_3, window_bounds = array<i64: 1, 16, 16>}]} {
    %c16_i32 = arith.constant 16 : i32
    %0 = arith.muli %arg1, %c16_i32 : i32
    %1 = tpu.assume_multiple %0, 8 : i32
    %c0 = arith.constant 0 : index
    %2 = arith.index_cast %1 : i32 to index
    %c0_0 = arith.constant 0 : index
    %3 = vector.load %arg3[%c0, %2, %c0_0] : memref<1x24x128xf32, #tpu.memory_space<vmem>>, vector<1x24x128xf32>
    %4 = vector.shape_cast %3 : vector<1x24x128xf32> to vector<24x128xf32>
    %c0_1 = arith.constant 0 : index
    %c0_2 = arith.constant 0 : index
    %c0_3 = arith.constant 0 : index
    %5 = vector.load %arg4[%c0_1, %c0_2, %c0_3] : memref<1x16x16xf32, #tpu.memory_space<vmem>>, vector<1x16x16xf32>
    %6 = vector.shape_cast %5 : vector<1x16x16xf32> to vector<16x16xf32>
    %7 = vector.extract_strided_slice %4 {offsets = [0, 0], sizes = [16, 128], strides = [1, 1]} : vector<24x128xf32> to vector<16x128xf32>
    %8 = vector.extract_strided_slice %7 {offsets = [0, 0], sizes = [16, 16], strides = [1, 1]} : vector<16x128xf32> to vector<16x16xf32>
    %c0_4 = arith.constant 0 : index
    %c0_5 = arith.constant 0 : index
    %c0_6 = arith.constant 0 : index
    %c0_7 = arith.constant 0 : index
    %9 = vector.load %arg2[%c0_4, %c0_5, %c0_6, %c0_7] : memref<1x9x16x16xf32, #tpu.memory_space<vmem>>, vector<1x1x16x16xf32>
    %10 = vector.shape_cast %9 : vector<1x1x16x16xf32> to vector<16x16xf32>
    %11 = arith.mulf %10, %8 : vector<16x16xf32>
    %c127_i32 = arith.constant 127 : i32
    %12 = tpu.dynamic_rotate %7 by %c127_i32 dim 1 : vector<16x128xf32>, i32 -> vector<16x128xf32>
    %13 = vector.extract_strided_slice %12 {offsets = [0, 0], sizes = [16, 16], strides = [1, 1]} : vector<16x128xf32> to vector<16x16xf32>
    %c0_8 = arith.constant 0 : index
    %c1 = arith.constant 1 : index
    %c0_9 = arith.constant 0 : index
    %c0_10 = arith.constant 0 : index
    %14 = vector.load %arg2[%c0_8, %c1, %c0_9, %c0_10] : memref<1x9x16x16xf32, #tpu.memory_space<vmem>>, vector<1x1x16x16xf32>
    %15 = vector.shape_cast %14 : vector<1x1x16x16xf32> to vector<16x16xf32>
    %16 = arith.mulf %15, %13 : vector<16x16xf32>
    %17 = arith.addf %11, %16 : vector<16x16xf32>
    %c126_i32 = arith.constant 126 : i32
    %18 = tpu.dynamic_rotate %7 by %c126_i32 dim 1 : vector<16x128xf32>, i32 -> vector<16x128xf32>
    %19 = vector.extract_strided_slice %18 {offsets = [0, 0], sizes = [16, 16], strides = [1, 1]} : vector<16x128xf32> to vector<16x16xf32>
    %c0_11 = arith.constant 0 : index
    %c2 = arith.constant 2 : index
    %c0_12 = arith.constant 0 : index
    %c0_13 = arith.constant 0 : index
    %20 = vector.load %arg2[%c0_11, %c2, %c0_12, %c0_13] : memref<1x9x16x16xf32, #tpu.memory_space<vmem>>, vector<1x1x16x16xf32>
    %21 = vector.shape_cast %20 : vector<1x1x16x16xf32> to vector<16x16xf32>
    %22 = arith.mulf %21, %19 : vector<16x16xf32>
    %23 = arith.addf %17, %22 : vector<16x16xf32>
    %c23_i32 = arith.constant 23 : i32
    %24 = tpu.dynamic_rotate %4 by %c23_i32 dim 0 : vector<24x128xf32>, i32 -> vector<24x128xf32>
    %25 = vector.extract_strided_slice %24 {offsets = [0, 0], sizes = [16, 128], strides = [1, 1]} : vector<24x128xf32> to vector<16x128xf32>
    %26 = vector.extract_strided_slice %25 {offsets = [0, 0], sizes = [16, 16], strides = [1, 1]} : vector<16x128xf32> to vector<16x16xf32>
    %c0_14 = arith.constant 0 : index
    %c3 = arith.constant 3 : index
    %c0_15 = arith.constant 0 : index
    %c0_16 = arith.constant 0 : index
    %27 = vector.load %arg2[%c0_14, %c3, %c0_15, %c0_16] : memref<1x9x16x16xf32, #tpu.memory_space<vmem>>, vector<1x1x16x16xf32>
    %28 = vector.shape_cast %27 : vector<1x1x16x16xf32> to vector<16x16xf32>
    %29 = arith.mulf %28, %26 : vector<16x16xf32>
    %30 = arith.addf %23, %29 : vector<16x16xf32>
    %c0_17 = arith.constant 0 : index
    %c4 = arith.constant 4 : index
    %c0_18 = arith.constant 0 : index
    %c0_19 = arith.constant 0 : index
    %31 = vector.load %arg2[%c0_17, %c4, %c0_18, %c0_19] : memref<1x9x16x16xf32, #tpu.memory_space<vmem>>, vector<1x1x16x16xf32>
    %32 = vector.shape_cast %31 : vector<1x1x16x16xf32> to vector<16x16xf32>
    %33 = arith.mulf %32, %6 : vector<16x16xf32>
    %34 = arith.addf %30, %33 : vector<16x16xf32>
    %c126_i32_20 = arith.constant 126 : i32
    %35 = tpu.dynamic_rotate %25 by %c126_i32_20 dim 1 : vector<16x128xf32>, i32 -> vector<16x128xf32>
    %36 = vector.extract_strided_slice %35 {offsets = [0, 0], sizes = [16, 16], strides = [1, 1]} : vector<16x128xf32> to vector<16x16xf32>
    %c0_21 = arith.constant 0 : index
    %c5 = arith.constant 5 : index
    %c0_22 = arith.constant 0 : index
    %c0_23 = arith.constant 0 : index
    %37 = vector.load %arg2[%c0_21, %c5, %c0_22, %c0_23] : memref<1x9x16x16xf32, #tpu.memory_space<vmem>>, vector<1x1x16x16xf32>
    %38 = vector.shape_cast %37 : vector<1x1x16x16xf32> to vector<16x16xf32>
    %39 = arith.mulf %38, %36 : vector<16x16xf32>
    %40 = arith.addf %34, %39 : vector<16x16xf32>
    %c22_i32 = arith.constant 22 : i32
    %41 = tpu.dynamic_rotate %4 by %c22_i32 dim 0 : vector<24x128xf32>, i32 -> vector<24x128xf32>
    %42 = vector.extract_strided_slice %41 {offsets = [0, 0], sizes = [16, 128], strides = [1, 1]} : vector<24x128xf32> to vector<16x128xf32>
    %43 = vector.extract_strided_slice %42 {offsets = [0, 0], sizes = [16, 16], strides = [1, 1]} : vector<16x128xf32> to vector<16x16xf32>
    %c0_24 = arith.constant 0 : index
    %c6 = arith.constant 6 : index
    %c0_25 = arith.constant 0 : index
    %c0_26 = arith.constant 0 : index
    %44 = vector.load %arg2[%c0_24, %c6, %c0_25, %c0_26] : memref<1x9x16x16xf32, #tpu.memory_space<vmem>>, vector<1x1x16x16xf32>
    %45 = vector.shape_cast %44 : vector<1x1x16x16xf32> to vector<16x16xf32>
    %46 = arith.mulf %45, %43 : vector<16x16xf32>
    %47 = arith.addf %40, %46 : vector<16x16xf32>
    %c127_i32_27 = arith.constant 127 : i32
    %48 = tpu.dynamic_rotate %42 by %c127_i32_27 dim 1 : vector<16x128xf32>, i32 -> vector<16x128xf32>
    %49 = vector.extract_strided_slice %48 {offsets = [0, 0], sizes = [16, 16], strides = [1, 1]} : vector<16x128xf32> to vector<16x16xf32>
    %c0_28 = arith.constant 0 : index
    %c7 = arith.constant 7 : index
    %c0_29 = arith.constant 0 : index
    %c0_30 = arith.constant 0 : index
    %50 = vector.load %arg2[%c0_28, %c7, %c0_29, %c0_30] : memref<1x9x16x16xf32, #tpu.memory_space<vmem>>, vector<1x1x16x16xf32>
    %51 = vector.shape_cast %50 : vector<1x1x16x16xf32> to vector<16x16xf32>
    %52 = arith.mulf %51, %49 : vector<16x16xf32>
    %53 = arith.addf %47, %52 : vector<16x16xf32>
    %c126_i32_31 = arith.constant 126 : i32
    %54 = tpu.dynamic_rotate %42 by %c126_i32_31 dim 1 : vector<16x128xf32>, i32 -> vector<16x128xf32>
    %55 = vector.extract_strided_slice %54 {offsets = [0, 0], sizes = [16, 16], strides = [1, 1]} : vector<16x128xf32> to vector<16x16xf32>
    %c0_32 = arith.constant 0 : index
    %c8 = arith.constant 8 : index
    %c0_33 = arith.constant 0 : index
    %c0_34 = arith.constant 0 : index
    %56 = vector.load %arg2[%c0_32, %c8, %c0_33, %c0_34] : memref<1x9x16x16xf32, #tpu.memory_space<vmem>>, vector<1x1x16x16xf32>
    %57 = vector.shape_cast %56 : vector<1x1x16x16xf32> to vector<16x16xf32>
    %58 = arith.mulf %57, %55 : vector<16x16xf32>
    %59 = arith.addf %53, %58 : vector<16x16xf32>
    %c0_35 = arith.constant 0 : index
    %c0_36 = arith.constant 0 : index
    %c0_37 = arith.constant 0 : index
    %60 = vector.load %arg5[%c0_35, %c0_36, %c0_37] : memref<1x16x16xf32, #tpu.memory_space<vmem>>, vector<1x16x16xf32>
    %61 = vector.shape_cast %60 : vector<1x16x16xf32> to vector<16x16xf32>
    %62 = vector.shape_cast %59 : vector<16x16xf32> to vector<1x16x16xf32>
    tpu.vector_store %arg5[%c0_35, %c0_36, %c0_37], %62 {strides = array<i32>} : memref<1x16x16xf32, #tpu.memory_space<vmem>>, vector<1x16x16xf32>,
    return
  }
  func.func @transform_0(%arg0: i32, %arg1: i32) -> (i32, i32, i32, i32) {
    %c0_i32 = arith.constant 0 : i32
    %c0_i32_0 = arith.constant 0 : i32
    %c0_i32_1 = arith.constant 0 : i32
    return %arg0, %c0_i32, %arg1, %c0_i32_0 : i32, i32, i32, i32
  }
  func.func @transform_1(%arg0: i32, %arg1: i32) -> (i32, i32, i32) {
    %c0_i32 = arith.constant 0 : i32
    %c0_i32_0 = arith.constant 0 : i32
    %c0_i32_1 = arith.constant 0 : i32
    return %arg0, %c0_i32, %c0_i32_0 : i32, i32, i32
  }
  func.func @transform_2(%arg0: i32, %arg1: i32) -> (i32, i32, i32) {
    %c0_i32 = arith.constant 0 : i32
    %c0_i32_0 = arith.constant 0 : i32
    return %arg0, %arg1, %c0_i32 : i32, i32, i32
  }
  func.func @transform_3(%arg0: i32, %arg1: i32) -> (i32, i32, i32) {
    %c0_i32 = arith.constant 0 : i32
    %c0_i32_0 = arith.constant 0 : i32
    return %arg0, %arg1, %c0_i32 : i32, i32, i32
  }
}

</mosaic_0001>

<bundles_post_ra>
// kernel: tpu_custom_call.1
= control target key start
LH: loop header
LB: loop body
LE: loop exit
PB: predicated region body
PF: predicated region fallthrough
CT: control target
= control target key end

     0   :  { %s1098_s0 = inlined_call_operand.hbm [shape: f32[2,9,16,16], index: 0, kind: input, shape index: {}]   ;;  %s1099_s1 = inlined_call_operand.hbm [shape: f32[2,24,128], index: 1, kind: input, shape index: {}]   ;;  %s1100_s2 = inlined_call_operand.hbm [shape: f32[2,16,16], index: 2, kind: input, shape index: {}]   ;;  %s1101_s3 = inlined_call_operand.hbm [shape: f32[2,16,16], index: 3, kind: output, shape index: {}]  }
   0x1   :  { %1109 = sst [smem:[#allocation16_spill]] %s1099_s1 }
   0x2   :  { %8 = vsyncpa [#allocation3], 0 }
   0x3   :  { %10 = vsyncpa [#allocation3 + $0x1], 0 }
   0x4   :  { %11 = vsyncpa [#allocation6], 0 }
   0x5   :  { %13 = vsyncpa [#allocation6 + $0x1], 0 }
   0x6   :  { %14 = vsyncpa [#allocation4], 0 }
   0x7   :  { %16 = vsyncpa [#allocation4 + $0x1], 0  ;;  %s865_s12 = smov 0   ;;  %s867_s13 = smov 0  }
   0x8   :  { %s869_s14 = smov 0   ;;  %s871_s15 = smov 0  }
   0x9   :  { %s873_s16 = smov 0   ;;  %s875_s17 = smov 0  }
   0xa LB: > { %1110 = sst [smem:[#allocation12_spill]] %s821_s14  ;;  %s896_s18 = sadd.s32 4294967295, %s833_s17   ;;  %s833_s17 = sphi %s875_s17, %s22_s17   ;;  %s829_s16 = sphi %s873_s16, %s1127_s16   ;;  %s825_s15 = sphi %s871_s15, %s1126_s15   ;;  %s821_s14 = sphi %s869_s14, %s1125_s14   ;;  %s817_s13 = sphi %s867_s13, %s1129_s13   ;;  %s813_s12 = sphi %s865_s12, %s1128_s12  }
   0xb   : > { %1111 = sst [smem:[#allocation13_spill]] %s829_s16  ;;  %s547_s19 = sadd.s32 4294967294, %s833_s17  }
   0xc   : > { %s34_s20 = sadd.s32 1, %s829_s16  ;;  %s43_s21 = sadd.s32 1, %s821_s14 }
   0xd   : > { %p36_p0 = scmp.ge.s32.totalorder %s34_s20, 2  ;;  %p50_p1 = scmp.ne.s32.totalorder %s821_s14, %s817_s13 }
   0xe   : > { %p51_p2 = scmp.eq.s32.totalorder %s833_s17, 0  ;;  %p56_p3 = scmp.ne.s32.totalorder %s817_s13, %s813_s12 }
   0xf   : > { %s1131_s20 = smov (%p36_p0, %s34_s20), 0  ;;  %p57_p5 = scmp.eq.s32.totalorder %s896_s18, 0 }
  0x10   : > { %1112 = sst [smem:[#allocation14_spill]] %s1131_s20  ;;  %p908_p4 = por %p51_p2, %p50_p1 }
  0x11   : > { %s38_s23 = ssub.s32 %s829_s16, %s1131_s20  ;;  %p136_p6 = scmp.eq.s32.totalorder %s896_s18, 1 }
  0x12   : > { %p41_p7 = scmp.eq.s32.totalorder %s38_s23, 0  ;;  %p916_p8 = por %p57_p5, %p56_p3 }
  0x13   : > { %p920_p9 = por %p136_p6, %p50_p1  ;;  %p142_p10 = scmp.eq.s32.totalorder %s547_s19, 1 }
  0x14   : > { %s925_s26 = scalar_select %p41_p7, %s821_s14, %s43_s21  }
  0x15   : > { %p927_p11 = por %p142_p10, %p56_p3  ;;  %p609_p13 = scmp.lt.s32.totalorder %s833_s17, 2 }
  0x16   : > { %1116 = sst [smem:[#allocation15_spill]] %s925_s26  ;;  %s934_s28 = sand.u32 1, %s821_s14  }
  0x17   : > { %p938_p0 = pnand %p609_p13, %p908_p4  ;;  %s185_s30 = sand.u32 1, %s833_s17  }
  0x18   : > { %s583_s4 = smul.u32 24, %s934_s28  ;;  %p555_p1 = scmp.ge.s32.totalorder %s833_s17, 1 }
  0x19   : > { %s584_s5 = smul.u32 384, %s829_s16  ;;  %s1119_s1 = sld [smem:[#allocation16_spill]] }
  0x1a   : > { %s189_s9 = scalar_lea.vmem [#allocation5], %s583_s4  ;;  %p227_p2 = scmp.lt.s32.totalorder %s833_s17, 3 }
  0x1b   : > { %s196_s10 = sshll.u32 %s189_s9, 4  ;;  %s950_s11 = scalar_lea.sflag [#allocation6], %s185_s30  ;;  %s197_s10 = int_to_ptr.vmem [resolvable:$true] %s196_s10 }
  0x1c   : > { %p667_p3 = pneg %p938_p0  ;;  %s678_s19 = scalar_lea.vmem %s197_s10, 384 }
  0x1d   : > { %p679_p4 = scmp.ne.s32.totalorder %s197_s10, %s678_s19  ;;  %s835_s21 = smov [#allocation5]  }
  0x1e   : > { %s683_s22 = sshll.u32 %s835_s21, 4  ;;  %s684_s22 = int_to_ptr.vmem [resolvable:$false] %s683_s22 }
  0x1f   : > { %s195_s8 = scalar_lea.hbm %s1119_s1, %s584_s5  ;;  %p681_p5 = pnand %p679_p4, %p667_p3 }
  0x20   : > { %s685_s23 = scalar_lea.vmem %s684_s22, 768  ;;  %p686_p7 = scmp.lt.s32.totalorder %s197_s10, %s684_s22 }
  0x21   : > { %p682_p6 = pneg %p681_p5  ;;  %p687_p10 = scmp.lt.s32.totalorder %s685_s23, %s678_s19 }
  0x23   : > { %p688_p13 = por %p687_p10, %p686_p7 }
  0x25   : > { %p689_p12 = pnand %p688_p13, %p682_p6 }
  0x27   : > { %692 = shalt.err (!%p689_p12)
}
  0x28   : > { %s1104_s4 = smov 128   ;;  %s1106_s30 = smov 8  }
  0x29   : > { %601 = dma.hbm_to_vmem [thread:$0]  (!%p938_p0), %s195_s8, 384, %s197_s10, %s950_s11, %s1104_s4, %s1104_s4, %s1106_s30  }
  0x2a   : > { %p967_p12 = pnand %p555_p1, %p227_p2  ;;  %s581_s6 = smul.u32 144, %s934_s28 }
  0x2b   : > { %s552_s7 = sshll.u32 %s934_s28, 4  ;;  %s582_s9 = smul.u32 2304, %s829_s16 }
  0x2c   : > { %s579_s19 = sshll.u32 %s829_s16, 8  ;;  %s166_s1 = scalar_lea.vmem [#allocation2], %s581_s6 }
  0x2d   : > { %s174_s23 = scalar_lea.hbm %s1098_s0, %s582_s9  ;;  %s175_s20 = sshll.u32 %s166_s1, 4  ;;  %s176_s20 = int_to_ptr.vmem [resolvable:$true] %s175_s20 }
  0x2e   : > { %s981_s8 = scalar_lea.hbm %s1100_s2, %s579_s19  ;;  %s163_s10 = scalar_lea.sflag [#allocation3], %s934_s28 }
  0x2f   : > { %s706_s4 = scalar_lea.vmem %s176_s20, 2304  ;;  %s838_s30 = smov [#allocation2]  }
  0x30   : > { %p707_p1 = scmp.ne.s32.totalorder %s176_s20, %s706_s4  ;;  %s711_s16 = sshll.u32 %s838_s30, 4  ;;  %s712_s16 = int_to_ptr.vmem [resolvable:$false] %s711_s16 }
  0x31   : > { %s713_s21 = scalar_lea.vmem %s712_s16, 4608  ;;  %p714_p5 = scmp.lt.s32.totalorder %s176_s20, %s712_s16 }
  0x32   : > { %p709_p2 = pnand %p707_p1, %p667_p3  ;;  %p715_p6 = scmp.lt.s32.totalorder %s713_s21, %s706_s4 }
  0x34   : > { %p710_p4 = pneg %p709_p2  ;;  %p716_p7 = por %p715_p6, %p714_p5 }
  0x36   : > { %p717_p10 = pnand %p716_p7, %p710_p4 }
  0x38   : > { %720 = shalt.err (!%p717_p10)
}
  0x39   : > { %s1121_s1 = smov 8   ;;  %s1122_s14 = smov 128  }
  0x3a   : > { %598 = dma.hbm_to_vmem [thread:$0]  (!%p938_p0), %s174_s23, 2304, %s176_s20, %s163_s10, %s1122_s14, %s1122_s14, %s1121_s1  }
  0x3b   : > { %s210_s26 = scalar_lea.vmem [#allocation7], %s552_s7  ;;  %s839_s16 = smov [#allocation7]  }
  0x3c   : > { %s219_s28 = sshll.u32 %s210_s26, 4  ;;  %s739_s4 = sshll.u32 %s839_s16, 4  ;;  %s220_s28 = int_to_ptr.vmem [resolvable:$true] %s219_s28  ;;  %s740_s4 = int_to_ptr.vmem [resolvable:$false] %s739_s4 }
  0x3d   : > { %s734_s6 = scalar_lea.vmem %s220_s28, 256  ;;  %s741_s30 = scalar_lea.vmem %s740_s4, 512 }
  0x3e   : > { %p735_p13 = scmp.ne.s32.totalorder %s220_s28, %s734_s6  ;;  %p742_p4 = scmp.lt.s32.totalorder %s220_s28, %s740_s4 }
  0x3f   : > { %p743_p5 = scmp.lt.s32.totalorder %s741_s30, %s734_s6 }
  0x40   : > { %p737_p1 = pnand %p735_p13, %p667_p3 }
  0x41   : > { %p744_p6 = por %p743_p5, %p742_p4 }
  0x42   : > { %p738_p2 = pneg %p737_p1 }
  0x44   : > { %p745_p7 = pnand %p744_p6, %p738_p2 }
  0x46   : > { %748 = shalt.err (!%p745_p7)
}
  0x47   : > { %604 = dma.hbm_to_vmem [thread:$0]  (!%p938_p0), %s981_s8, 256, %s220_s28, %s950_s11, %s1122_s14, %s1122_s14, %s1121_s1  }
  0x48   : > { %231 = sbr.rel (%p967_p12) target bundleno = 234 (0xea), region = 32  ;;  %s1005_s20 = sand.u32 (!%p967_p12), 1, %s817_s13  }
  0x49   : > { %s585_s7 = smul.u32 (!%p967_p12), 144, %s1005_s20  ;;  %s234_s9 = scalar_lea.sflag (!%p967_p12), [#allocation3], %s1005_s20 }
  0x4b   : > { %s1009_s19 = scalar_lea.vmem (!%p967_p12), [#allocation2], %s585_s7 }
  0x4d   : > { %800 = dma.done.wait (%p916_p8), %s234_s9, 2304  }
  0x4e   : > { %802 = vsyncadd (%p916_p8), %s234_s9, 4294964992  ;;  %s242_s29 = sand.u32 1, %s896_s18   ;;  %s586_s11 = smul.u32 24, %s1005_s20 }
  0x4f   : > { %s243_s5 = scalar_lea.sflag [#allocation6], %s242_s29 }
  0x50   : > { %s246_s22 = scalar_lea.vmem [#allocation5], %s586_s11 }
  0x51   : > { %804 = dma.done.wait (%p916_p8), %s243_s5, 640  }
  0x52   : > { %806 = vsyncadd (%p916_p8), %s243_s5, 4294966656  ;;  %v327_v0 = vlaneseq  ;;  %v293_v2 = vld [vmem:[%s246_s22] sm:$0xff]  ;;  %v294_v3 = vld [vmem:[%s246_s22 + $0x8] sm:$0xff]  ;;  %s840_s23 = smov 127   ;;  %s841_s8 = smov 126   ;;  %vm392_vm2 = vcmask 130048  }
  0x53   : > { %302 = vrot.lane.b32.xlu0 %v293_v2, %s840_s23  ;;  %313 = vrot.lane.b32.xlu1 %v293_v2, %s841_s8  ;;  %v295_v4 = vld [vmem:[%s246_s22 + $0x10] sm:$0xff]  ;;  %v324_v5 = vrot.slane %v293_v2, 1  ;;  %v325_v6 = vrot.slane %v294_v3, 1  ;;  %v357_v8 = vrot.slane %v293_v2, 2  ;;  %v358_v11 = vrot.slane %v294_v3, 2  ;;  %v298_v15 = vld [vmem:[%s1009_s19] sm:$0xff] }
  0x54   : > { %v328_v1 = vshrl.u32 %v327_v0, 7  ;;  %v326_v7 = vrot.slane %v295_v4, 1  ;;  %v359_v12 = vrot.slane %v295_v4, 2  ;;  %s556_s18 = sshll.u32 %s1005_s20, 4  ;;  %v558_v16 = vld [vmem:[%s1009_s19 + $0x10] sm:$0xff]  ;;  %v560_v17 = vld [vmem:[%s1009_s19 + $0x20] sm:$0xff]  ;;  %v300_v18 = vmul.f32 %v298_v15, %v293_v2 }
  0x55   : > { %v562_v19 = vld [vmem:[%s1009_s19 + $0x30] sm:$0xff]  ;;  %v299_v22 = vld [vmem:[%s1009_s19 + $0x8] sm:$0xff]  ;;  %v559_v25 = vld [vmem:[%s1009_s19 + $0x18] sm:$0xff]  ;;  %s255_s24 = scalar_lea.vmem [#allocation7], %s556_s18  ;;  %s287_s10 = scalar_lea.vmem [#allocation8], %s556_s18 }
  0x56   : > { %vm329_vm0 = vcmp.lt.s32.totalorder %v328_v1, 7  ;;  %vm360_vm1 = vcmp.lt.s32.totalorder %v328_v1, 6  ;;  %v561_v26 = vld [vmem:[%s1009_s19 + $0x28] sm:$0xff]  ;;  %v296_v27 = vld [vmem:[%s255_s24] sm:$0xff]  ;;  %v564_v28 = vld [vmem:[%s1009_s19 + $0x40] sm:$0xff]  ;;  %v301_v31 = vmul.f32 %v299_v22, %v294_v3  ;;  %s411_s21 = sshll.u32 %s287_s10, 4  ;;  %s1045_s21 = int_to_ptr.vmem [resolvable:$true] %s411_s21 }
  0x57   : > { %304 = vrot.lane.b32.xlu0 %v294_v3, %s840_s23  ;;  %315 = vrot.lane.b32.xlu1 %v294_v3, %s841_s8  ;;  %v331_v9 = vsel %vm329_vm0, %v324_v5, %v325_v6  ;;  %v330_v10 = vsel %vm329_vm0, %v325_v6, %v326_v7  ;;  %v362_v13 = vsel %vm360_vm1, %v357_v8, %v358_v11  ;;  %v563_v32 = vld [vmem:[%s1009_s19 + $0x38] sm:$0xff]  ;;  %v568_v35 = vld [vmem:[%s1009_s19 + $0x60] sm:$0xff]  ;;  %s580_s1 = sshll.u32 %s825_s15, 8  ;;  %s396_s6 = scalar_lea.sflag [#allocation4], %s1005_s20 }
  0x58   : > { %v361_v14 = vsel %vm360_vm1, %v358_v11, %v359_v12  ;;  %v335_v29 = vmul.f32 %v562_v19, %v331_v9  ;;  %v342_v39 = vmul.f32 %v564_v28, %v296_v27  ;;  %v566_v40 = vld [vmem:[%s1009_s19 + $0x50] sm:$0xff]  ;;  %v297_v41 = vld [vmem:[%s255_s24 + $0x8] sm:$0xff]  ;;  %v565_v42 = vld [vmem:[%s1009_s19 + $0x48] sm:$0xff]  ;;  %v336_v43 = vmul.f32 %v563_v32, %v330_v10  ;;  %s1050_s28 = scalar_lea.hbm %s1101_s3, %s580_s1  ;;  %s749_s16 = scalar_lea.vmem %s1045_s21, 256 }
  0x59   : > { %v366_v46 = vmul.f32 %v568_v35, %v362_v13  ;;  %v569_v49 = vld [vmem:[%s1009_s19 + $0x68] sm:$0xff]  ;;  %v343_v53 = vmul.f32 %v565_v42, %v297_v41  ;;  %v567_v54 = vld [vmem:[%s1009_s19 + $0x58] sm:$0xff]  ;;  %v570_v55 = vld [vmem:[%s1009_s19 + $0x70] sm:$0xff]  ;;  %p750_p8 = scmp.ne.s32.totalorder %s1045_s21, %s749_s16  ;;  %s842_s15 = smov [#allocation8]  }
  0x5a   : > { %v367_v58 = vmul.f32 %v569_v49, %v361_v14  ;;  %v571_v1 = vld [vmem:[%s1009_s19 + $0x78] sm:$0xff]  ;;  %v572_v2 = vld [vmem:[%s1009_s19 + $0x80] sm:$0xff]  ;;  %v573_v3 = vld [vmem:[%s1009_s19 + $0x88] sm:$0xff]  ;;  %s753_s4 = sshll.u32 %s842_s15, 4  ;;  %s754_s4 = int_to_ptr.vmem [resolvable:$false] %s753_s4 }
  0x5b   : > { %346 = vrot.lane.b32.xlu0 %v331_v9, %s841_s8  ;;  %348 = vrot.lane.b32.xlu1 %v330_v10, %s841_s8  ;;  %p751_p0 = pnand %p750_p8, %p920_p9  ;;  %s755_s30 = scalar_lea.vmem %s754_s4, 512 }
  0x5c   : > { %p756_p12 = scmp.lt.s32.totalorder %s1045_s21, %s754_s4  ;;  %p757_p10 = scmp.lt.s32.totalorder %s755_s30, %s749_s16 }
  0x5d   : > { %p752_p3 = pneg %p751_p0 }
  0x5e   : > { %p758_p13 = por %p757_p10, %p756_p12 }
  0x5f   : > { %370 = vrot.lane.b32.xlu0 %v362_v13, %s840_s23  ;;  %372 = vrot.lane.b32.xlu1 %v361_v14, %s840_s23 }
  0x60   : > { %p759_p1 = pnand %p758_p13, %p752_p3 }
  0x63   : > { %381 = vrot.lane.b32.xlu0 %v362_v13, %s841_s8  ;;  %383 = vrot.lane.b32.xlu1 %v361_v14, %s841_s8 }
  0xc5   : > { %v303_v20 = vpop.permute.xlu0 %302  ;;  %v314_v21 = vpop.permute.xlu1 %313 }
  0xc6   : > { %v309_v23 = vmul.f32 %v558_v16, %v303_v20  ;;  %v320_v24 = vmul.f32 %v560_v17, %v314_v21 }
  0xc8   : > { %v311_v30 = vadd.f32 %v309_v23, %v300_v18 }
  0xc9   : > { %v305_v33 = vpop.permute.xlu0 %304  ;;  %v316_v34 = vpop.permute.xlu1 %315 }
  0xca   : > { %v322_v36 = vadd.f32 %v320_v24, %v311_v30  ;;  %v310_v37 = vmul.f32 %v559_v25, %v305_v33  ;;  %v321_v38 = vmul.f32 %v561_v26, %v316_v34 }
  0xcc   : > { %v337_v44 = vadd.f32 %v335_v29, %v322_v36  ;;  %v312_v45 = vadd.f32 %v310_v37, %v301_v31 }
  0xcd   : > { %v347_v47 = vpop.permute.xlu0 %346  ;;  %v349_v48 = vpop.permute.xlu1 %348 }
  0xce   : > { %v323_v50 = vadd.f32 %v321_v38, %v312_v45  ;;  %v344_v51 = vadd.f32 %v342_v39, %v337_v44  ;;  %v353_v52 = vmul.f32 %v566_v40, %v347_v47  ;;  %v354_v62 = vmul.f32 %v567_v54, %v349_v48 }
  0xd0   : > { %v338_v56 = vadd.f32 %v336_v43, %v323_v50  ;;  %v355_v57 = vadd.f32 %v353_v52, %v344_v51 }
  0xd1   : > { %v371_v59 = vpop.permute.xlu0 %370  ;;  %v373_v60 = vpop.permute.xlu1 %372 }
  0xd2   : > { %v345_v61 = vadd.f32 %v343_v53, %v338_v56  ;;  %v368_v63 = vadd.f32 %v366_v46, %v355_v57  ;;  %v377_v0 = vmul.f32 %v570_v55, %v371_v59  ;;  %v378_v5 = vmul.f32 %v571_v1, %v373_v60 }
  0xd4   : > { %v356_v4 = vadd.f32 %v354_v62, %v345_v61  ;;  %v379_v8 = vadd.f32 %v377_v0, %v368_v63 }
  0xd5   : > { %v382_v6 = vpop.permute.xlu0 %381  ;;  %v384_v7 = vpop.permute.xlu1 %383 }
  0xd6   : > { %v369_v9 = vadd.f32 %v367_v58, %v356_v4  ;;  %v388_v10 = vmul.f32 %v572_v2, %v382_v6  ;;  %v389_v11 = vmul.f32 %v573_v3, %v384_v7 }
  0xd8   : > { %v380_v12 = vadd.f32 %v378_v5, %v369_v9  ;;  %v390_v13 = vadd.f32 %v388_v10, %v379_v8 }
  0xda   : > { %393 = vst.msk [vmem:[%s287_s10] sm:$0xff] %vm392_vm2, %v390_v13  ;;  %v391_v14 = vadd.f32 %v389_v11, %v380_v12 }
  0xdc   : > { %394 = vst.msk [vmem:[%s287_s10 + $0x8] sm:$0xff] %vm392_vm2, %v391_v14 }
  0xdd   : > { %762 = shalt.err (!%p759_p1)
}
  0xde   : > { %s763_s7 = scalar_lea.hbm %s1050_s28, 256  ;;  %s767_s29 = scalar_lea.hbm %s1101_s3, 512 }
  0xdf   : > { %p764_p2 = scmp.ne.s32.totalorder %s1050_s28, %s763_s7  ;;  %p768_p6 = scmp.lt.s32.totalorder %s1050_s28, %s1101_s3 }
  0xe0   : > { %p769_p7 = scmp.lt.s32.totalorder %s767_s29, %s763_s7 }
  0xe1   : > { %p765_p4 = pnand %p764_p2, %p920_p9 }
  0xe2   : > { %p770_p8 = por %p769_p7, %p768_p6 }
  0xe3   : > { %p766_p5 = pneg %p765_p4 }
  0xe5   : > { %p771_p0 = pnand %p770_p8, %p766_p5 }
  0xe7   : > { %774 = shalt.err (!%p771_p0)
}
  0xe8   : > { %s843_s22 = smov 128   ;;  %s844_s23 = smov 8  }
  0xe9   : > { %593 = dma.vmem_to_hbm [thread:$0]  (%p920_p9), %s1045_s21, 256, %s1050_s28, %s396_s6, %s843_s22, %s843_s22, %s844_s23  }
  0xea PF: > { %s426_s8 = sand.u32 1, %s813_s12   ;;  %p1123_p3 = scmp.ge.s32.totalorder %s833_s17, 2 }
  0xeb   : > { %s427_s18 = scalar_lea.sflag [#allocation4], %s426_s8 }
  0xec   : > { %p606_p12 = pnand %p1123_p3, %p927_p11 }
  0xee   : > { %p607_p10 = pneg %p606_p12 }
  0xf0   : > { %808 = dma.done.wait (%p607_p10), %s427_s18, 256  }
  0xf1   : > { %810 = vsyncadd (%p607_p10), %s427_s18, 4294967040  ;;  %s22_s17 = sadd.s32 1, %s833_s17   ;;  %s1124_s24 = sld [smem:[#allocation12_spill]] }
  0xf2   : > { %p19_p13 = scmp.ge.s32.totalorder %s22_s17, 4   ;;  %s1125_s14 = sld [smem:[#allocation15_spill]] }
  0xf3   : > { %s1126_s15 = sld [smem:[#allocation13_spill]]  ;;  %s1128_s12 = smov %s817_s13 }
  0xf4   : > { %s1127_s16 = sld [smem:[#allocation14_spill]]  ;;  %21 = sbr.rel (!%p19_p13) target bundleno = 10 (0xa), region = 110 }
  0xf7   : > { %s1129_s13 = smov %s1124_s24 }
  0xf9   :  { %432 = vsyncpa [#allocation3], 1 }
  0xfa   :  { %434 = vsyncpa [#allocation3 + $0x1], 1 }
  0xfb   :  { %435 = vsyncpa [#allocation6], 1 }
  0xfc   :  { %437 = vsyncpa [#allocation6 + $0x1], 1 }
  0xfd   :  { %438 = vsyncpa [#allocation4], 1 }
  0xfe   :  { %440 = vsyncpa [#allocation4 + $0x1], 1 }

</bundles_post_ra>
